<compile_context>
chip_gen: v7x
topology: tpu7x:2x2x1
jax: 0.10.0
libtpu: 0.0.40
codegen_flags: <defaults>
</compile_context>

<pallas_src>
import functools
import math

import jax
import jax.numpy as jnp
from jax.experimental import pallas as pl
from jax.experimental.pallas import tpu as pltpu


def _round_up(x: int, m: int) -> int:
    return ((x + m - 1) // m) * m


def _pick_tile(n_p: int, cap: int) -> int:
    """Largest multiple of 128 that divides n_p and is <= cap (>= 128)."""
    best = 128
    d = 128
    while d <= n_p and d <= cap:
        if n_p % d == 0:
            best = d
        d += 128
    return best


def _vmem_limit_bytes() -> int:
    """~75% of physical VMEM, capped at 100 MiB (safe on v5e/v6e=128MiB, v7x=64MiB)."""
    try:
        cap = int(pltpu.get_tpu_info().vmem_capacity_bytes)
    except Exception:
        cap = 64 * 1024 * 1024
    return int(min(cap * 3 // 4, 100 * 1024 * 1024))


# --------------------------------------------------------------------------- #
# Kernel 1: h0 = tanh(X @ W)   (row-tiled, lane-dense padded output)
# --------------------------------------------------------------------------- #
def _transform_kernel(x_ref, w_ref, h_ref, *, active: bool):
    h = jnp.dot(x_ref[...], w_ref[...], preferred_element_type=jnp.float32)
    if active:
        h = jnp.tanh(h)          # tanh in f32 (v5e EUP has no bf16)
    h_ref[...] = h.astype(h_ref.dtype)


# --------------------------------------------------------------------------- #
# Kernel 2: h <- adj @ h, applied n_prop times.
#   grid = (pass o, row tile i, contraction tile k)     -- all axes sequential
#   h0_hbm : transformed features left in HBM (pl.ANY), DMA'd once into slab
#   hbuf   : flat (2*Np, Fp) VMEM ping-pong slab; pass o reads slot o%2,
#            writes slot (o+1)%2, so the `order` loop never round-trips HBM
#   acc    : (tile_m, Fp) f32 accumulator over the contraction axis
#   out_ref: written only on the final pass (index_map collapses otherwise)
# --------------------------------------------------------------------------- #
def _propagate_kernel(h0_hbm, adj_ref, out_ref, hbuf, acc, dma_sem,
                      *, n_p: int, tile_k: int, n_prop: int):
    o = pl.program_id(0)
    i = pl.program_id(1)
    k = pl.program_id(2)
    nk = pl.num_programs(2)
    tile_m = adj_ref.shape[0]

    # One-time: DMA h0 (HBM) into ping-pong slot 0.
    @pl.when((o == 0) & (i == 0) & (k == 0))
    def _():
        cp = pltpu.make_async_copy(h0_hbm, hbuf.at[pl.ds(0, n_p), :], dma_sem.at[0])
        cp.start()
        cp.wait()

    # Source rows of the previous h (slot o % 2), contraction block k.
    src_off = pl.multiple_of((o % 2) * n_p + k * tile_k, 128)
    h_block = hbuf[pl.ds(src_off, tile_k), :]

    partial = jnp.dot(adj_ref[...], h_block, preferred_element_type=jnp.float32)

    @pl.when(k == 0)
    def _():
        acc[...] = partial

    @pl.when(k > 0)
    def _():
        acc[...] += partial

    last_k = k == nk - 1

    # Intermediate passes: store the new row block into the other ping-pong slot.
    @pl.when(last_k & (o < n_prop - 1))
    def _():
        dst_off = pl.multiple_of(((o + 1) % 2) * n_p + i * tile_m, 128)
        hbuf[pl.ds(dst_off, tile_m), :] = acc[...].astype(hbuf.dtype)

    # Final pass: the only pass that writes the HBM output.
    @pl.when(last_k & (o == n_prop - 1))
    def _():
        out_ref[...] = acc[...].astype(out_ref.dtype)


# --------------------------------------------------------------------------- #
# Wrapper
# --------------------------------------------------------------------------- #
def ngnn_forward(features, weight, adj, *, order: int = 1, active: bool = True,
                 compute_dtype=jnp.bfloat16,
                 tile_m_cap: int = 512, tile_k_cap: int = 2048):
    n, f_in = features.shape
    f_in_w, f_out = weight.shape
    assert f_in == f_in_w
    assert adj.shape == (n, n)

    # PyTorch module does 1 spmm + (order - 1) extra == max(order, 1) total.
    n_prop = max(order, 1)

    # Pad only to the lane/sublane grain; tiles are divisors of the padded N.
    f_out_p = _round_up(f_out, 128)
    n_p = _round_up(n, 128)
    tile_m = _pick_tile(n_p, tile_m_cap)
    tile_k = _pick_tile(n_p, tile_k_cap)
    assert n_p % tile_m == 0 and n_p % tile_k == 0

    cbytes = jnp.dtype(compute_dtype).itemsize
    obytes = jnp.dtype(features.dtype).itemsize
    vmem_limit = _vmem_limit_bytes()

    feats_p = features if n_p == n else jnp.pad(features, ((0, n_p - n), (0, 0)))
    w_p = weight if f_out_p == f_out else jnp.pad(weight, ((0, 0), (0, f_out_p - f_out)))
    adj_p = adj if n_p == n else jnp.pad(adj, ((0, n_p - n), (0, n_p - n)))
    # Cast once (skipped if the caller already provides adj in compute_dtype).
    adj_c = adj_p if adj_p.dtype == jnp.dtype(compute_dtype) else adj_p.astype(compute_dtype)

    # ---- pass 0: h0 = tanh(X @ W) ----------------------------------------------
    h0 = pl.pallas_call(
        functools.partial(_transform_kernel, active=active),
        out_shape=jax.ShapeDtypeStruct((n_p, f_out_p), compute_dtype),
        grid_spec=pltpu.PrefetchScalarGridSpec(
            num_scalar_prefetch=0,
            grid=(n_p // tile_m,),
            in_specs=[
                pl.BlockSpec((tile_m, f_in), lambda i: (i, 0)),
                pl.BlockSpec((f_in, f_out_p), lambda i: (0, 0)),
            ],
            out_specs=pl.BlockSpec((tile_m, f_out_p), lambda i: (i, 0)),
        ),
        compiler_params=pltpu.CompilerParams(
            dimension_semantics=("parallel",),
            vmem_limit_bytes=vmem_limit,
        ),
        cost_estimate=pl.CostEstimate(
            flops=2 * n_p * f_in * f_out_p,
            transcendentals=(n_p * f_out_p) if active else 0,
            bytes_accessed=n_p * f_in * 4 + f_in * f_out_p * 4 + n_p * f_out_p * cbytes,
        ),
    )(feats_p, w_p)

    # ---- passes 1..n_prop: h <- adj @ h -----------------------------------------
    last = n_prop - 1

    out_p = pl.pallas_call(
        functools.partial(_propagate_kernel, n_p=n_p, tile_k=tile_k, n_prop=n_prop),
        out_shape=jax.ShapeDtypeStruct((n_p, f_out_p), features.dtype),
        grid_spec=pltpu.PrefetchScalarGridSpec(
            num_scalar_prefetch=0,
            grid=(n_prop, n_p // tile_m, n_p // tile_k),
            in_specs=[
                # h0 stays in HBM; one manual DMA into the slab at step (0,0,0).
                pl.BlockSpec(memory_space=pl.ANY),
                # adj streamed in (tile_m, tile_k) blocks, double-buffered by Pallas.
                pl.BlockSpec((tile_m, tile_k), lambda o, i, k: (i, k)),
            ],
            # Only the final pass walks the row blocks -> intermediate passes pay
            # no HBM writeback.
            out_specs=pl.BlockSpec(
                (tile_m, f_out_p),
                lambda o, i, k: (jnp.where(o == last, i, 0), 0)),
            scratch_shapes=[
                pltpu.VMEM((2 * n_p, f_out_p), compute_dtype),   # ping-pong h slab
                pltpu.VMEM((tile_m, f_out_p), jnp.float32),      # f32 accumulator
                pltpu.SemaphoreType.DMA((1,)),                   # h0 load semaphore
            ],
        ),
        compiler_params=pltpu.CompilerParams(
            # All axes MUST stay "arbitrary": the ping-pong h scratch carries state
            # across passes and row tiles; any parallel/megacore split would
            # silently corrupt the result.
            dimension_semantics=("arbitrary", "arbitrary", "arbitrary"),
            vmem_limit_bytes=vmem_limit,
        ),
        cost_estimate=pl.CostEstimate(
            flops=2 * n_prop * n_p * n_p * f_out_p,
            transcendentals=0,
            bytes_accessed=(n_prop * n_p * n_p * cbytes      # adj streamed each pass
                            + n_p * f_out_p * cbytes          # h0 read once
                            + n_p * f_out_p * obytes),        # output written once
        ),
    )(h0, adj_c)

    return out_p[:n, :f_out]


# --------------------------------------------------------------------------- #
# Pure-JAX reference (module semantics)
# --------------------------------------------------------------------------- #
def _reference(features, weight, adj, *, order: int = 1, active: bool = True):
    h = features @ weight
    if active:
        h = jnp.tanh(h)
    for _ in range(max(order, 1)):
        h = adj @ h
    return h


if __name__ == "__main__":
    # Small shapes that still exercise divisor tiling (n_p = 384 -> tile 384) and
    # lane padding of the output (96 -> 128).
    N = 384
    IN_FEATURES = 64
    OUT_FEATURES = 96
    ORDER = 2
    ACTIVE = True

    key = jax.random.PRNGKey(0)
    k_feat, k_w, k_adj = jax.random.split(key, 3)

    features = jax.random.normal(k_feat, (N, IN_FEATURES), dtype=jnp.float32)

    # Xavier-uniform init (matches torch.nn.init.xavier_uniform_).
    limit = math.sqrt(6.0 / (IN_FEATURES + OUT_FEATURES))
    weight = jax.random.uniform(
        k_w, (IN_FEATURES, OUT_FEATURES), dtype=jnp.float32,
        minval=-limit, maxval=limit,
    )

    # Deterministic dense "sparse" adjacency: random nonneg matrix, row-normalized.
    raw_adj = jax.random.uniform(k_adj, (N, N), dtype=jnp.float32)
    adj = raw_adj / jnp.sum(raw_adj, axis=1, keepdims=True)

    ref = _reference(features, weight, adj, order=ORDER, active=ACTIVE)

    # 1) f32 operand path: tight correctness check.
    out_f32 = ngnn_forward(features, weight, adj, order=ORDER, active=ACTIVE,
                           compute_dtype=jnp.float32)
    out_f32 = jax.block_until_ready(out_f32)
    assert out_f32.shape == (N, OUT_FEATURES)
    assert jnp.allclose(out_f32, ref, atol=1e-3, rtol=1e-3), \
        "Pallas f32 output mismatch vs reference"

    # 2) Default bf16-operand path (f32 accumulation, f32 tanh): looser tolerance.
    out_bf16 = ngnn_forward(features, weight, adj, order=ORDER, active=ACTIVE)
    out_bf16 = jax.block_until_ready(out_bf16)
    assert out_bf16.shape == (N, OUT_FEATURES)
    assert jnp.allclose(out_bf16, ref, atol=1e-2, rtol=5e-2), \
        "Pallas bf16 output mismatch vs reference"

    # 3) order=1 path (single propagation, final-pass-only output write).
    out_o1 = ngnn_forward(features, weight, adj, order=1, active=ACTIVE,
                          compute_dtype=jnp.float32)
    out_o1 = jax.block_until_ready(out_o1)
    ref_o1 = _reference(features, weight, adj, order=1, active=ACTIVE)
    assert jnp.allclose(out_o1, ref_o1, atol=1e-3, rtol=1e-3), \
        "Pallas order=1 output mismatch vs reference"

    print("KERNEL_OK")
</pallas_src>

<mosaic_0001>
module attributes {stable_mosaic.version = 11 : i64} {
  func.func @_transform_kernel(%arg0: i32, %arg1: memref<384x64xf32, #tpu.memory_space<vmem>>, %arg2: memref<64x128xf32, #tpu.memory_space<vmem>>, %arg3: memref<384x128xf32, #tpu.memory_space<vmem>>) attributes {dimension_semantics = [#tpu.dimension_semantics<parallel>], iteration_bounds = array<i64: 1>, scalar_prefetch = 0 : i64, scratch_operands = 0 : i64, tpu.core_type = #tpu.core_type<tc>, window_params = [{transform_indices = @transform_0, window_bounds = array<i64: 384, 64>}, {pipeline_mode = #tpu.pipeline_mode<synchronous>, transform_indices = @transform_1, window_bounds = array<i64: 64, 128>}, {transform_indices = @transform_2, window_bounds = array<i64: 384, 128>}]} {
    %c0 = arith.constant 0 : index
    %c0_0 = arith.constant 0 : index
    %0 = vector.load %arg1[%c0, %c0_0] : memref<384x64xf32, #tpu.memory_space<vmem>>, vector<384x64xf32>
    %c0_1 = arith.constant 0 : index
    %c0_2 = arith.constant 0 : index
    %1 = vector.load %arg2[%c0_1, %c0_2] : memref<64x128xf32, #tpu.memory_space<vmem>>, vector<64x128xf32>
    %cst = arith.constant dense<0.000000e+00> : vector<384x128xf32>
    %2 = tpu.matmul %0, %1, %cst {dimension_numbers = #tpu.dot_dimension_numbers<[1], [0], [0], [1], [0, 0, 1, 1], [], []>} : vector<384x64xf32>, vector<64x128xf32>, vector<384x128xf32> -> vector<384x128xf32>
    %3 = math.tanh %2 : vector<384x128xf32>
    %c0_3 = arith.constant 0 : index
    %c0_4 = arith.constant 0 : index
    %4 = vector.load %arg3[%c0_3, %c0_4] : memref<384x128xf32, #tpu.memory_space<vmem>>, vector<384x128xf32>
    tpu.vector_store %arg3[%c0_3, %c0_4], %3 {strides = array<i32>} : memref<384x128xf32, #tpu.memory_space<vmem>>, vector<384x128xf32>,
    return
  }
  func.func @transform_0(%arg0: i32) -> (i32, i32) {
    %c0_i32 = arith.constant 0 : i32
    %c0_i32_0 = arith.constant 0 : i32
    return %arg0, %c0_i32 : i32, i32
  }
  func.func @transform_1(%arg0: i32) -> (i32, i32) {
    %c0_i32 = arith.constant 0 : i32
    %c0_i32_0 = arith.constant 0 : i32
    %c0_i32_1 = arith.constant 0 : i32
    return %c0_i32, %c0_i32_0 : i32, i32
  }
  func.func @transform_2(%arg0: i32) -> (i32, i32) {
    %c0_i32 = arith.constant 0 : i32
    %c0_i32_0 = arith.constant 0 : i32
    return %arg0, %c0_i32 : i32, i32
  }
}

</mosaic_0001>

<bundles_post_ra>
// kernel: tpu_custom_call.1
= control target key start
LH: loop header
LB: loop body
LE: loop exit
PB: predicated region body
PF: predicated region fallthrough
CT: control target
= control target key end

     0   :  { %vm68_vm0 = vcmask 523264   ;;  %s1215_s0 = inlined_call_operand.vmem [shape: f32[384,64], index: 0, kind: input, shape index: {}]   ;;  %s1216_s1 = inlined_call_operand.vmem [shape: f32[64,128], index: 1, kind: input, shape index: {}]   ;;  %s1217_s2 = inlined_call_operand.hbm [shape: f32[384,128], index: 2, kind: output, shape index: {}]  }
   0x1   :  { %v60_v0 = vld [vmem:[%s1216_s1] sm:$0xff]  ;;  %v61_v1 = vld [vmem:[%s1216_s1 + $0x8] sm:$0xff]  ;;  %v62_v2 = vld [vmem:[%s1216_s1 + $0x10] sm:$0xff] }
   0x2   :  { %v822_v3 = vpack.c.bf16 %v61_v1, %v60_v0  ;;  %v63_v4 = vld [vmem:[%s1216_s1 + $0x18] sm:$0xff]  ;;  %v64_v6 = vld [vmem:[%s1216_s1 + $0x20] sm:$0xff]  ;;  %v65_v7 = vld [vmem:[%s1216_s1 + $0x28] sm:$0xff] }
   0x3   :  { %v826_v5 = vpack.c.bf16 %v63_v4, %v62_v2  ;;  %v12_v8 = vld [vmem:[%s1215_s0] sm:$0xff]  ;;  %v830_v10 = vpack.c.bf16 %v65_v7, %v64_v6  ;;  %v66_v11 = vld [vmem:[%s1216_s1 + $0x30] sm:$0xff]  ;;  %v67_v12 = vld [vmem:[%s1216_s1 + $0x38] sm:$0xff] }
   0x4   :  { %823 = vmatprep.subr.bf16.mxu0 %v822_v3  ;;  %838 = vmatprep.subr.bf16.mxu1 %v822_v3  ;;  %v36_v9 = vld [vmem:[%s1215_s0 + $0xc0] sm:$0xff]  ;;  %v834_v13 = vpack.c.bf16 %v67_v12, %v66_v11  ;;  %v13_v14 = vld [vmem:[%s1215_s0 + $0x8] sm:$0xff]  ;;  %v14_v16 = vld [vmem:[%s1215_s0 + $0x10] sm:$0xff] }
   0x5   :  { %825 = vmatpush3.bf16.msra.mxu0 %v822_v3  ;;  %842 = vmatpush3.bf16.msra.mxu1 %v822_v3  ;;  %v37_v15 = vld [vmem:[%s1215_s0 + $0xc8] sm:$0xff]  ;;  %v38_v17 = vld [vmem:[%s1215_s0 + $0xd0] sm:$0xff] }
   0x6   :  { %827 = vmatprep.subr.bf16.mxu0 %v826_v5  ;;  %839 = vmatprep.subr.bf16.mxu1 %v826_v5 }
   0x7   :  { %750 = vmatprep.mubr.msk.f32.mxu0 %vm68_vm0, %v12_v8  ;;  %786 = vmatprep.mubr.msk.f32.mxu1 %vm68_vm0, %v36_v9 }
   0x9   :  { %829 = vmatpush3.bf16.msra.mxu0 %v826_v5  ;;  %843 = vmatpush3.bf16.msra.mxu1 %v826_v5 }
   0xa   :  { %831 = vmatprep.subr.bf16.mxu0 %v830_v10  ;;  %840 = vmatprep.subr.bf16.mxu1 %v830_v10 }
   0xd   :  { %833 = vmatpush3.bf16.msra.mxu0 %v830_v10  ;;  %844 = vmatpush3.bf16.msra.mxu1 %v830_v10 }
   0xe   :  { %835 = vmatprep.subr.bf16.mxu0 %v834_v13  ;;  %841 = vmatprep.subr.bf16.mxu1 %v834_v13 }
  0x11   :  { %837 = vmatpush3.bf16.msra.mxu0 %v834_v13  ;;  %845 = vmatpush3.bf16.msra.mxu1 %v834_v13 }
  0x12   :  { %7 = vsyncpa [#allocation3], 0  ;;  %v15_v18 = vld [vmem:[%s1215_s0 + $0x18] sm:$0xff]  ;;  %v16_v20 = vld [vmem:[%s1215_s0 + $0x20] sm:$0xff] }
  0x13   :  { %v39_v19 = vld [vmem:[%s1215_s0 + $0xd8] sm:$0xff]  ;;  %v40_v21 = vld [vmem:[%s1215_s0 + $0xe0] sm:$0xff]  ;;  %v17_v22 = vld [vmem:[%s1215_s0 + $0x28] sm:$0xff] }
  0x14   :  { %751 = vmatmul.mubr.msk.f32.vlgmr.msra.gmra.mrb[0].mxu0 %vm68_vm0, %v13_v14  ;;  %787 = vmatmul.mubr.msk.f32.vlgmr.msra.gmra.mrb[0].mxu1 %vm68_vm0, %v37_v15  ;;  %v41_v23 = vld [vmem:[%s1215_s0 + $0xe8] sm:$0xff]  ;;  %v18_v24 = vld [vmem:[%s1215_s0 + $0x30] sm:$0xff]  ;;  %v19_v26 = vld [vmem:[%s1215_s0 + $0x38] sm:$0xff] }
  0x15   :  { %753 = vmatprep.mubr.msk.f32.mxu0 %vm68_vm0, %v14_v16  ;;  %789 = vmatprep.mubr.msk.f32.mxu1 %vm68_vm0, %v38_v17  ;;  %v42_v25 = vld [vmem:[%s1215_s0 + $0xf0] sm:$0xff]  ;;  %v43_v27 = vld [vmem:[%s1215_s0 + $0xf8] sm:$0xff]  ;;  %v20_v28 = vld [vmem:[%s1215_s0 + $0x40] sm:$0xff] }
  0x16   :  { %v44_v29 = vld [vmem:[%s1215_s0 + $0x100] sm:$0xff]  ;;  %v21_v30 = vld [vmem:[%s1215_s0 + $0x48] sm:$0xff]  ;;  %v22_v32 = vld [vmem:[%s1215_s0 + $0x50] sm:$0xff] }
  0x17   :  { %v45_v31 = vld [vmem:[%s1215_s0 + $0x108] sm:$0xff]  ;;  %v46_v33 = vld [vmem:[%s1215_s0 + $0x110] sm:$0xff]  ;;  %v23_v34 = vld [vmem:[%s1215_s0 + $0x58] sm:$0xff] }
  0x18   :  { %754 = vmatmul.mubr.msk.f32.gmra.mrb[2].mxu0 %vm68_vm0, %v15_v18  ;;  %790 = vmatmul.mubr.msk.f32.gmra.mrb[2].mxu1 %vm68_vm0, %v39_v19  ;;  %v47_v35 = vld [vmem:[%s1215_s0 + $0x118] sm:$0xff]  ;;  %v24_v36 = vld [vmem:[%s1215_s0 + $0x60] sm:$0xff]  ;;  %v25_v38 = vld [vmem:[%s1215_s0 + $0x68] sm:$0xff] }
  0x19   :  { %756 = vmatprep.mubr.msk.f32.mxu0 %vm68_vm0, %v16_v20  ;;  %792 = vmatprep.mubr.msk.f32.mxu1 %vm68_vm0, %v40_v21  ;;  %v48_v37 = vld [vmem:[%s1215_s0 + $0x120] sm:$0xff]  ;;  %v49_v39 = vld [vmem:[%s1215_s0 + $0x128] sm:$0xff]  ;;  %v26_v40 = vld [vmem:[%s1215_s0 + $0x70] sm:$0xff] }
  0x1a   :  { %v50_v41 = vld [vmem:[%s1215_s0 + $0x130] sm:$0xff]  ;;  %v27_v42 = vld [vmem:[%s1215_s0 + $0x78] sm:$0xff]  ;;  %v28_v44 = vld [vmem:[%s1215_s0 + $0x80] sm:$0xff] }
  0x1b   :  { %v51_v43 = vld [vmem:[%s1215_s0 + $0x138] sm:$0xff]  ;;  %v52_v45 = vld [vmem:[%s1215_s0 + $0x140] sm:$0xff]  ;;  %v29_v46 = vld [vmem:[%s1215_s0 + $0x88] sm:$0xff] }
  0x1c   :  { %757 = vmatmul.mubr.msk.f32.gmra.mrb[4].mxu0 %vm68_vm0, %v17_v22  ;;  %793 = vmatmul.mubr.msk.f32.gmra.mrb[4].mxu1 %vm68_vm0, %v41_v23  ;;  %v53_v47 = vld [vmem:[%s1215_s0 + $0x148] sm:$0xff]  ;;  %v30_v48 = vld [vmem:[%s1215_s0 + $0x90] sm:$0xff]  ;;  %v31_v50 = vld [vmem:[%s1215_s0 + $0x98] sm:$0xff] }
  0x1d   :  { %759 = vmatprep.mubr.msk.f32.mxu0 %vm68_vm0, %v18_v24  ;;  %795 = vmatprep.mubr.msk.f32.mxu1 %vm68_vm0, %v42_v25  ;;  %v54_v49 = vld [vmem:[%s1215_s0 + $0x150] sm:$0xff]  ;;  %v55_v51 = vld [vmem:[%s1215_s0 + $0x158] sm:$0xff]  ;;  %v32_v52 = vld [vmem:[%s1215_s0 + $0xa0] sm:$0xff] }
  0x1e   :  { %v56_v53 = vld [vmem:[%s1215_s0 + $0x160] sm:$0xff]  ;;  %v33_v54 = vld [vmem:[%s1215_s0 + $0xa8] sm:$0xff]  ;;  %v34_v56 = vld [vmem:[%s1215_s0 + $0xb0] sm:$0xff] }
  0x1f   :  { %v57_v55 = vld [vmem:[%s1215_s0 + $0x168] sm:$0xff]  ;;  %v58_v57 = vld [vmem:[%s1215_s0 + $0x170] sm:$0xff]  ;;  %v35_v58 = vld [vmem:[%s1215_s0 + $0xb8] sm:$0xff] }
  0x20   :  { %760 = vmatmul.mubr.msk.f32.gmra.mrb[6].mxu0 %vm68_vm0, %v19_v26  ;;  %796 = vmatmul.mubr.msk.f32.gmra.mrb[6].mxu1 %vm68_vm0, %v43_v27  ;;  %v59_v59 = vld [vmem:[%s1215_s0 + $0x178] sm:$0xff]  ;;  %s969_s0 = smov [#allocation2]  }
  0x21   :  { %762 = vmatprep.mubr.msk.f32.mxu0 %vm68_vm0, %v20_v28  ;;  %798 = vmatprep.mubr.msk.f32.mxu1 %vm68_vm0, %v44_v29  ;;  %s619_s5 = sshll.u32 %s969_s0, 4  ;;  %s620_s5 = int_to_ptr.vmem [resolvable:$true] %s619_s5 }
  0x22   :  { %s945_s6 = scalar_lea.vmem %s620_s5, 6144  ;;  %p950_p1 = scmp.lt.s32.totalorder %s620_s5, %s620_s5 }
  0x23   :  { %p946_p0 = scmp.ne.s32.totalorder %s620_s5, %s945_s6  ;;  %p951_p2 = scmp.lt.s32.totalorder %s945_s6, %s945_s6 }
  0x24   :  { %763 = vmatmul.mubr.msk.f32.gmra.mrb[8].mxu0 %vm68_vm0, %v21_v30  ;;  %799 = vmatmul.mubr.msk.f32.gmra.mrb[8].mxu1 %vm68_vm0, %v45_v31 }
  0x25   :  { %765 = vmatprep.mubr.msk.f32.mxu0 %vm68_vm0, %v22_v32  ;;  %801 = vmatprep.mubr.msk.f32.mxu1 %vm68_vm0, %v46_v33  ;;  %p952_p3 = por %p951_p2, %p950_p1 }
  0x27   :  { %p953_p4 = pnand %p952_p3, %p946_p0 }
  0x28   :  { %766 = vmatmul.mubr.msk.f32.gmra.mrb[10].mxu0 %vm68_vm0, %v23_v34  ;;  %802 = vmatmul.mubr.msk.f32.gmra.mrb[10].mxu1 %vm68_vm0, %v47_v35 }
  0x29   :  { %768 = vmatprep.mubr.msk.f32.mxu0 %vm68_vm0, %v24_v36  ;;  %804 = vmatprep.mubr.msk.f32.mxu1 %vm68_vm0, %v48_v37 }
  0x2c   :  { %769 = vmatmul.mubr.msk.f32.gmra.mrb[12].mxu0 %vm68_vm0, %v25_v38  ;;  %805 = vmatmul.mubr.msk.f32.gmra.mrb[12].mxu1 %vm68_vm0, %v49_v39 }
  0x2d   :  { %771 = vmatprep.mubr.msk.f32.mxu0 %vm68_vm0, %v26_v40  ;;  %807 = vmatprep.mubr.msk.f32.mxu1 %vm68_vm0, %v50_v41 }
  0x30   :  { %772 = vmatmul.mubr.msk.f32.gmra.mrb[14].mxu0 %vm68_vm0, %v27_v42  ;;  %808 = vmatmul.mubr.msk.f32.gmra.mrb[14].mxu1 %vm68_vm0, %v51_v43 }
  0x31   :  { %774 = vmatprep.mubr.msk.f32.mxu0 %vm68_vm0, %v28_v44  ;;  %810 = vmatprep.mubr.msk.f32.mxu1 %vm68_vm0, %v52_v45 }
  0x34   :  { %775 = vmatmul.mubr.msk.f32.gmra.mrb[16].mxu0 %vm68_vm0, %v29_v46  ;;  %811 = vmatmul.mubr.msk.f32.gmra.mrb[16].mxu1 %vm68_vm0, %v53_v47 }
  0x35   :  { %777 = vmatprep.mubr.msk.f32.mxu0 %vm68_vm0, %v30_v48  ;;  %813 = vmatprep.mubr.msk.f32.mxu1 %vm68_vm0, %v54_v49 }
  0x38   :  { %778 = vmatmul.mubr.msk.f32.gmra.mrb[18].mxu0 %vm68_vm0, %v31_v50  ;;  %814 = vmatmul.mubr.msk.f32.gmra.mrb[18].mxu1 %vm68_vm0, %v55_v51 }
  0x39   :  { %780 = vmatprep.mubr.msk.f32.mxu0 %vm68_vm0, %v32_v52  ;;  %816 = vmatprep.mubr.msk.f32.mxu1 %vm68_vm0, %v56_v53 }
  0x3c   :  { %781 = vmatmul.mubr.msk.f32.gmra.mrb[20].mxu0 %vm68_vm0, %v33_v54  ;;  %817 = vmatmul.mubr.msk.f32.gmra.mrb[20].mxu1 %vm68_vm0, %v57_v55 }
  0x3d   :  { %783 = vmatprep.mubr.msk.f32.mxu0 %vm68_vm0, %v34_v56  ;;  %819 = vmatprep.mubr.msk.f32.mxu1 %vm68_vm0, %v58_v57 }
  0x40   :  { %784 = vmatmul.mubr.msk.f32.gmra.mrb[22].mxu0 %vm68_vm0, %v35_v58  ;;  %820 = vmatmul.mubr.msk.f32.gmra.mrb[22].mxu1 %vm68_vm0, %v59_v59 }
  0xe7   :  { %v752_v60 = vpop.f32.mrb[0].mxu0  ;;  %v788_v61 = vpop.f32.mrb[0].mxu1 }
  0xe8   :  { %849 = vtanh.f32 %v752_v60  ;;  %v279_v62 = vpop.f32.mrb[1].mxu0  ;;  %v399_v63 = vpop.f32.mrb[1].mxu1 }
  0xe9   :  { %851 = vtanh.f32 %v788_v61 }
  0xea   :  { %853 = vtanh.f32 %v279_v62 }
  0xeb   :  { %855 = vtanh.f32 %v399_v63  ;;  %v755_v0 = vpop.f32.mrb[2].mxu0  ;;  %v791_v1 = vpop.f32.mrb[2].mxu1 }
  0xec   :  { %857 = vtanh.f32 %v755_v0  ;;  %v289_v2 = vpop.f32.mrb[3].mxu0  ;;  %v409_v3 = vpop.f32.mrb[3].mxu1 }
  0xed   :  { %859 = vtanh.f32 %v791_v1 }
  0xee   :  { %861 = vtanh.f32 %v289_v2 }
  0xef   :  { %863 = vtanh.f32 %v409_v3  ;;  %v758_v4 = vpop.f32.mrb[4].mxu0  ;;  %v794_v5 = vpop.f32.mrb[4].mxu1 }
  0xf0   :  { %865 = vtanh.f32 %v758_v4  ;;  %v299_v6 = vpop.f32.mrb[5].mxu0  ;;  %v419_v7 = vpop.f32.mrb[5].mxu1 }
  0xf1   :  { %867 = vtanh.f32 %v794_v5 }
  0xf2   :  { %v850_v8 = vpop.eup %849  ;;  %869 = vtanh.f32 %v299_v6 }
  0xf3   :  { %v852_v9 = vpop.eup %851  ;;  %567 = vst [vmem:[#allocation2 + $0x8] sm:$0xff] %v850_v8  ;;  %871 = vtanh.f32 %v419_v7  ;;  %v761_v10 = vpop.f32.mrb[6].mxu0 }
  0xf4   :  { %v797_v11 = vpop.f32.mrb[6].mxu1  ;;  %v854_v12 = vpop.eup %853  ;;  %591 = vst [vmem:[#allocation2 + $0xc8] sm:$0xff] %v852_v9  ;;  %873 = vtanh.f32 %v761_v10 }
  0xf5   :  { %v309_v13 = vpop.f32.mrb[7].mxu0  ;;  %v429_v14 = vpop.f32.mrb[7].mxu1  ;;  %566 = vst [vmem:[#allocation2] sm:$0xff] %v854_v12  ;;  %875 = vtanh.f32 %v797_v11 }
  0xf6   :  { %v856_v15 = vpop.eup %855  ;;  %877 = vtanh.f32 %v309_v13 }
  0xf7   :  { %v858_v16 = vpop.eup %857  ;;  %590 = vst [vmem:[#allocation2 + $0xc0] sm:$0xff] %v856_v15  ;;  %879 = vtanh.f32 %v429_v14  ;;  %v764_v18 = vpop.f32.mrb[8].mxu0 }
  0xf8   :  { %v860_v17 = vpop.eup %859  ;;  %569 = vst [vmem:[#allocation2 + $0x18] sm:$0xff] %v858_v16  ;;  %v800_v19 = vpop.f32.mrb[8].mxu1  ;;  %881 = vtanh.f32 %v764_v18 }
  0xf9   :  { %v862_v20 = vpop.eup %861  ;;  %593 = vst [vmem:[#allocation2 + $0xd8] sm:$0xff] %v860_v17  ;;  %v319_v21 = vpop.f32.mrb[9].mxu0  ;;  %883 = vtanh.f32 %v800_v19 }
  0xfa   :  { %v439_v22 = vpop.f32.mrb[9].mxu1  ;;  %v864_v23 = vpop.eup %863  ;;  %568 = vst [vmem:[#allocation2 + $0x10] sm:$0xff] %v862_v20  ;;  %885 = vtanh.f32 %v319_v21 }
  0xfb   :  { %v866_v24 = vpop.eup %865  ;;  %592 = vst [vmem:[#allocation2 + $0xd0] sm:$0xff] %v864_v23  ;;  %887 = vtanh.f32 %v439_v22  ;;  %v767_v26 = vpop.f32.mrb[10].mxu0 }
  0xfc   :  { %v868_v25 = vpop.eup %867  ;;  %571 = vst [vmem:[#allocation2 + $0x28] sm:$0xff] %v866_v24  ;;  %v803_v27 = vpop.f32.mrb[10].mxu1  ;;  %889 = vtanh.f32 %v767_v26 }
  0xfd   :  { %v870_v28 = vpop.eup %869  ;;  %595 = vst [vmem:[#allocation2 + $0xe8] sm:$0xff] %v868_v25  ;;  %v329_v29 = vpop.f32.mrb[11].mxu0  ;;  %891 = vtanh.f32 %v803_v27 }
  0xfe   :  { %v449_v30 = vpop.f32.mrb[11].mxu1  ;;  %v872_v31 = vpop.eup %871  ;;  %570 = vst [vmem:[#allocation2 + $0x20] sm:$0xff] %v870_v28  ;;  %893 = vtanh.f32 %v329_v29 }
  0xff   :  { %v874_v32 = vpop.eup %873  ;;  %594 = vst [vmem:[#allocation2 + $0xe0] sm:$0xff] %v872_v31  ;;  %895 = vtanh.f32 %v449_v30  ;;  %v770_v34 = vpop.f32.mrb[12].mxu0 }
 0x100   :  { %v876_v33 = vpop.eup %875  ;;  %573 = vst [vmem:[#allocation2 + $0x38] sm:$0xff] %v874_v32  ;;  %v806_v35 = vpop.f32.mrb[12].mxu1  ;;  %897 = vtanh.f32 %v770_v34 }
 0x101   :  { %v878_v36 = vpop.eup %877  ;;  %597 = vst [vmem:[#allocation2 + $0xf8] sm:$0xff] %v876_v33  ;;  %v339_v37 = vpop.f32.mrb[13].mxu0  ;;  %899 = vtanh.f32 %v806_v35 }
 0x102   :  { %v459_v38 = vpop.f32.mrb[13].mxu1  ;;  %v880_v39 = vpop.eup %879  ;;  %572 = vst [vmem:[#allocation2 + $0x30] sm:$0xff] %v878_v36  ;;  %901 = vtanh.f32 %v339_v37 }
 0x103   :  { %v882_v40 = vpop.eup %881  ;;  %596 = vst [vmem:[#allocation2 + $0xf0] sm:$0xff] %v880_v39  ;;  %903 = vtanh.f32 %v459_v38  ;;  %v773_v42 = vpop.f32.mrb[14].mxu0 }
 0x104   :  { %v884_v41 = vpop.eup %883  ;;  %575 = vst [vmem:[#allocation2 + $0x48] sm:$0xff] %v882_v40  ;;  %v809_v43 = vpop.f32.mrb[14].mxu1  ;;  %905 = vtanh.f32 %v773_v42 }
 0x105   :  { %v886_v44 = vpop.eup %885  ;;  %599 = vst [vmem:[#allocation2 + $0x108] sm:$0xff] %v884_v41  ;;  %v349_v45 = vpop.f32.mrb[15].mxu0  ;;  %907 = vtanh.f32 %v809_v43 }
 0x106   :  { %v469_v46 = vpop.f32.mrb[15].mxu1  ;;  %v888_v47 = vpop.eup %887  ;;  %574 = vst [vmem:[#allocation2 + $0x40] sm:$0xff] %v886_v44  ;;  %909 = vtanh.f32 %v349_v45 }
 0x107   :  { %v890_v48 = vpop.eup %889  ;;  %598 = vst [vmem:[#allocation2 + $0x100] sm:$0xff] %v888_v47  ;;  %911 = vtanh.f32 %v469_v46  ;;  %v776_v50 = vpop.f32.mrb[16].mxu0 }
 0x108   :  { %v892_v49 = vpop.eup %891  ;;  %577 = vst [vmem:[#allocation2 + $0x58] sm:$0xff] %v890_v48  ;;  %v812_v51 = vpop.f32.mrb[16].mxu1  ;;  %913 = vtanh.f32 %v776_v50 }
 0x109   :  { %v894_v52 = vpop.eup %893  ;;  %601 = vst [vmem:[#allocation2 + $0x118] sm:$0xff] %v892_v49  ;;  %v359_v53 = vpop.f32.mrb[17].mxu0  ;;  %915 = vtanh.f32 %v812_v51 }
 0x10a   :  { %v479_v54 = vpop.f32.mrb[17].mxu1  ;;  %v896_v55 = vpop.eup %895  ;;  %576 = vst [vmem:[#allocation2 + $0x50] sm:$0xff] %v894_v52  ;;  %917 = vtanh.f32 %v359_v53 }
 0x10b   :  { %v898_v56 = vpop.eup %897  ;;  %600 = vst [vmem:[#allocation2 + $0x110] sm:$0xff] %v896_v55  ;;  %919 = vtanh.f32 %v479_v54  ;;  %v779_v58 = vpop.f32.mrb[18].mxu0 }
 0x10c   :  { %v900_v57 = vpop.eup %899  ;;  %579 = vst [vmem:[#allocation2 + $0x68] sm:$0xff] %v898_v56  ;;  %v815_v59 = vpop.f32.mrb[18].mxu1  ;;  %921 = vtanh.f32 %v779_v58 }
 0x10d   :  { %v902_v60 = vpop.eup %901  ;;  %603 = vst [vmem:[#allocation2 + $0x128] sm:$0xff] %v900_v57  ;;  %v369_v61 = vpop.f32.mrb[19].mxu0  ;;  %923 = vtanh.f32 %v815_v59 }
 0x10e   :  { %v489_v62 = vpop.f32.mrb[19].mxu1  ;;  %v904_v63 = vpop.eup %903  ;;  %578 = vst [vmem:[#allocation2 + $0x60] sm:$0xff] %v902_v60  ;;  %925 = vtanh.f32 %v369_v61 }
 0x10f   :  { %v906_v0 = vpop.eup %905  ;;  %602 = vst [vmem:[#allocation2 + $0x120] sm:$0xff] %v904_v63  ;;  %927 = vtanh.f32 %v489_v62  ;;  %v782_v2 = vpop.f32.mrb[20].mxu0 }
 0x110   :  { %v908_v1 = vpop.eup %907  ;;  %581 = vst [vmem:[#allocation2 + $0x78] sm:$0xff] %v906_v0  ;;  %v818_v3 = vpop.f32.mrb[20].mxu1  ;;  %929 = vtanh.f32 %v782_v2 }
 0x111   :  { %v910_v4 = vpop.eup %909  ;;  %605 = vst [vmem:[#allocation2 + $0x138] sm:$0xff] %v908_v1  ;;  %v379_v5 = vpop.f32.mrb[21].mxu0  ;;  %931 = vtanh.f32 %v818_v3 }
 0x112   :  { %v499_v6 = vpop.f32.mrb[21].mxu1  ;;  %v912_v7 = vpop.eup %911  ;;  %580 = vst [vmem:[#allocation2 + $0x70] sm:$0xff] %v910_v4  ;;  %933 = vtanh.f32 %v379_v5 }
 0x113   :  { %v914_v8 = vpop.eup %913  ;;  %604 = vst [vmem:[#allocation2 + $0x130] sm:$0xff] %v912_v7  ;;  %935 = vtanh.f32 %v499_v6  ;;  %v785_v10 = vpop.f32.mrb[22].mxu0 }
 0x114   :  { %v916_v9 = vpop.eup %915  ;;  %583 = vst [vmem:[#allocation2 + $0x88] sm:$0xff] %v914_v8  ;;  %v821_v11 = vpop.f32.mrb[22].mxu1  ;;  %937 = vtanh.f32 %v785_v10 }
 0x115   :  { %v918_v12 = vpop.eup %917  ;;  %607 = vst [vmem:[#allocation2 + $0x148] sm:$0xff] %v916_v9  ;;  %v389_v13 = vpop.f32.mrb[23].mxu0  ;;  %939 = vtanh.f32 %v821_v11 }
 0x116   :  { %v509_v14 = vpop.f32.mrb[23].mxu1  ;;  %v920_v15 = vpop.eup %919  ;;  %582 = vst [vmem:[#allocation2 + $0x80] sm:$0xff] %v918_v12  ;;  %941 = vtanh.f32 %v389_v13 }
 0x117   :  { %v922_v16 = vpop.eup %921  ;;  %606 = vst [vmem:[#allocation2 + $0x140] sm:$0xff] %v920_v15  ;;  %943 = vtanh.f32 %v509_v14 }
 0x118   :  { %v924_v17 = vpop.eup %923  ;;  %585 = vst [vmem:[#allocation2 + $0x98] sm:$0xff] %v922_v16 }
 0x119   :  { %v926_v18 = vpop.eup %925  ;;  %609 = vst [vmem:[#allocation2 + $0x158] sm:$0xff] %v924_v17 }
 0x11a   :  { %v928_v19 = vpop.eup %927  ;;  %584 = vst [vmem:[#allocation2 + $0x90] sm:$0xff] %v926_v18 }
 0x11b   :  { %v930_v20 = vpop.eup %929  ;;  %608 = vst [vmem:[#allocation2 + $0x150] sm:$0xff] %v928_v19 }
 0x11c   :  { %v932_v21 = vpop.eup %931  ;;  %587 = vst [vmem:[#allocation2 + $0xa8] sm:$0xff] %v930_v20 }
 0x11d   :  { %v934_v22 = vpop.eup %933  ;;  %611 = vst [vmem:[#allocation2 + $0x168] sm:$0xff] %v932_v21 }
 0x11e   :  { %v936_v23 = vpop.eup %935  ;;  %586 = vst [vmem:[#allocation2 + $0xa0] sm:$0xff] %v934_v22 }
 0x11f   :  { %v938_v24 = vpop.eup %937  ;;  %610 = vst [vmem:[#allocation2 + $0x160] sm:$0xff] %v936_v23 }
 0x120   :  { %v940_v25 = vpop.eup %939  ;;  %589 = vst [vmem:[#allocation2 + $0xb8] sm:$0xff] %v938_v24 }
 0x121   :  { %v942_v26 = vpop.eup %941  ;;  %613 = vst [vmem:[#allocation2 + $0x178] sm:$0xff] %v940_v25 }
 0x122   :  { %v944_v27 = vpop.eup %943  ;;  %588 = vst [vmem:[#allocation2 + $0xb0] sm:$0xff] %v942_v26 }
 0x123   :  { %612 = vst [vmem:[#allocation2 + $0x170] sm:$0xff] %v944_v27 }
 0x124   :  { %956 = shalt.err (!%p953_p4)
}
 0x125   :  { %s957_s9 = scalar_lea.hbm %s1217_s2, 6144 }
 0x126   :  { %p958_p5 = scmp.ne.s32.totalorder %s1217_s2, %s957_s9  ;;  %p961_p6 = scmp.lt.u32.totalorder %s957_s9, %s1217_s2 }
 0x128   :  { %p963_p7 = pnand %p961_p6, %p958_p5 }
 0x12a   :  { %966 = shalt.err (!%p963_p7)
}
 0x12b   :  { %s970_s14 = smov 128   ;;  %s971_s15 = smov 8  }
 0x12c   :  { %625 = dma.vmem_to_hbm [thread:$0]  %s620_s5, 6144, %s1217_s2, [#allocation3], %s970_s14, %s970_s14, %s971_s15  }
 0x12d   :  { %967 = dma.done.wait [#allocation3], 6144  }
 0x12e   :  { %968 = vsyncadd [#allocation3], 4294961152 }
 0x12f   :  { %629 = vsyncpa [#allocation3], 1 }

</bundles_post_ra>
